<compile_context>
chip_gen: v7x
topology: tpu7x:2x2x1
jax: 0.10.0
libtpu: 0.0.40
codegen_flags: <defaults>
</compile_context>

<pallas_src>
import jax
import jax.numpy as jnp
from jax.experimental import pallas as pl
from jax.experimental.pallas import tpu as pltpu

HIDDEN = 768
MID = 512
BN_EPS = 1e-5


def bert_fake_head_kernel(x_ref, w1_ref, b1_ref, w2t_ref, b2_ref, o_ref):
    """Fused head: sigmoid( relu(x @ w1 + b1) @ w2' + b2' ), BN folded into w2'/b2'."""
    # fc1 on the MXU: bf16 x bf16 operands, f32 accumulation.
    h = jnp.dot(x_ref[...], w1_ref[...], preferred_element_type=jnp.float32)
    h = h + b1_ref[...]                  # [TB, 512] f32
    h = jnp.maximum(h, 0.0)              # relu (VPU)
    # batchnorm1d (eval) + dropout(eval) are folded / identity.
    # fc2 (BN-folded) as VPU multiply + XLU lane reduction -> avoids a
    # lane-padded (512, 1) MXU operand.
    logit = jnp.sum(h * w2t_ref[...], axis=-1, keepdims=True) + b2_ref[...]
    # sigmoid: exp on the EUP, reciprocal on the EUP (approx).
    o_ref[...] = pl.reciprocal(1.0 + jnp.exp(-logit), approx=True)


def bert_fake_head(cls_hs, w1, b1, gamma, beta, running_mean, running_var, w2, b2):
    B = cls_hs.shape[0]

    # ---- plain-JAX parameter folding (done once, outside the kernel) ----
    # BatchNorm1d inference affine: y = h * scale + shift
    scale = gamma * jax.lax.rsqrt(running_var + BN_EPS)          # [512]
    shift = beta - running_mean * scale                          # [512]
    # Fold the affine into fc2: (h*scale + shift) @ w2 + b2
    #   == h @ (scale[:,None]*w2) + (shift @ w2 + b2)
    w2_folded = scale[:, None] * w2                              # [512, 1]
    b2_folded = shift @ w2 + b2                                  # [1]
    w2t_2d = w2_folded.reshape(1, MID).astype(jnp.float32)       # [1, 512]
    b2_2d = b2_folded.reshape(1, 1).astype(jnp.float32)          # [1, 1]
    b1_2d = b1.reshape(1, MID).astype(jnp.float32)               # [1, 512]

    # ---- batch tiling (pad batch to a sublane-aligned tile multiple) ----
    SUB = 8
    B_sub = ((B + SUB - 1) // SUB) * SUB
    TB = min(512, B_sub)                 # batch tile; weights stay VMEM-resident
    nb = pl.cdiv(B_sub, TB)
    B_pad = nb * TB
    x = cls_hs if B_pad == B else jnp.pad(cls_hs, ((0, B_pad - B), (0, 0)))

    # bf16 matmul operands (halves the dominant HBM weight/activation bytes);
    # accumulation and all elementwise math remain f32.
    x_bf16 = x.astype(jnp.bfloat16)
    w1_bf16 = w1.astype(jnp.bfloat16)

    out = pl.pallas_call(
        bert_fake_head_kernel,
        out_shape=jax.ShapeDtypeStruct((B_pad, 1), jnp.float32),
        grid=(nb,),
        in_specs=[
            pl.BlockSpec((TB, HIDDEN), lambda i: (i, 0)),   # x: tiled over batch
            pl.BlockSpec((HIDDEN, MID), lambda i: (0, 0)),  # w1: resident
            pl.BlockSpec((1, MID), lambda i: (0, 0)),       # b1: resident
            pl.BlockSpec((1, MID), lambda i: (0, 0)),       # folded w2^T: resident
            pl.BlockSpec((1, 1), lambda i: (0, 0)),         # folded b2: resident
        ],
        out_specs=pl.BlockSpec((TB, 1), lambda i: (i, 0)),
        compiler_params=pltpu.CompilerParams(
            dimension_semantics=("parallel",)),
    )(x_bf16, w1_bf16, b1_2d, w2t_2d, b2_2d)

    return out[:B]


if __name__ == "__main__":
    B = 8  # small batch; sublane-aligned

    key = jax.random.PRNGKey(0)
    k_x, k_w1, k_b1, k_g, k_bt, k_rm, k_rv, k_w2, k_b2 = jax.random.split(key, 9)

    # "BERT" pooled CLS output (stand-in for the external backbone).
    cls_hs = jax.random.normal(k_x, (B, HIDDEN), dtype=jnp.float32)

    # Deterministically initialized parameters (shapes from the module __init__).
    w1 = jax.random.normal(k_w1, (HIDDEN, MID), dtype=jnp.float32) * 0.02
    b1 = jax.random.normal(k_b1, (MID,), dtype=jnp.float32) * 0.02
    gamma = 1.0 + 0.1 * jax.random.normal(k_g, (MID,), dtype=jnp.float32)
    beta = 0.1 * jax.random.normal(k_bt, (MID,), dtype=jnp.float32)
    running_mean = 0.1 * jax.random.normal(k_rm, (MID,), dtype=jnp.float32)
    running_var = jnp.abs(1.0 + 0.1 * jax.random.normal(k_rv, (MID,), dtype=jnp.float32))
    w2 = jax.random.normal(k_w2, (MID, 1), dtype=jnp.float32) * 0.02
    b2 = jax.random.normal(k_b2, (1,), dtype=jnp.float32) * 0.02

    out = bert_fake_head(cls_hs, w1, b1, gamma, beta, running_mean, running_var, w2, b2)
    out = jax.block_until_ready(out)

    # Reference in plain f32 JAX (same math, eval-mode BN / dropout identity).
    h = jnp.maximum(cls_hs @ w1 + b1, 0.0)
    h = (h - running_mean) / jnp.sqrt(running_var + BN_EPS) * gamma + beta
    ref = jax.nn.sigmoid(h @ w2 + b2)

    assert out.shape == (B, 1)
    # Looser tolerance: fc1 operands are bf16 and the sigmoid reciprocal is the
    # EUP approximate path; sigmoid outputs still match the f32 reference closely.
    assert jnp.allclose(out, ref, atol=1e-2, rtol=1e-2), (
        float(jnp.max(jnp.abs(out - ref))))

    print("KERNEL_OK")
</pallas_src>

<mosaic_0001>
module attributes {stable_mosaic.version = 11 : i64} {
  func.func @bert_fake_head_kernel(%arg0: i32, %arg1: memref<8x768xbf16, #tpu.memory_space<vmem>>, %arg2: memref<768x512xbf16, #tpu.memory_space<vmem>>, %arg3: memref<1x512xf32, #tpu.memory_space<vmem>>, %arg4: memref<1x512xf32, #tpu.memory_space<vmem>>, %arg5: memref<1x1xf32, #tpu.memory_space<vmem>>, %arg6: memref<8x1xf32, #tpu.memory_space<vmem>>) attributes {dimension_semantics = [#tpu.dimension_semantics<parallel>], iteration_bounds = array<i64: 1>, scalar_prefetch = 0 : i64, scratch_operands = 0 : i64, tpu.core_type = #tpu.core_type<tc>, window_params = [{transform_indices = @transform_0, window_bounds = array<i64: 8, 768>}, {pipeline_mode = #tpu.pipeline_mode<synchronous>, transform_indices = @transform_1, window_bounds = array<i64: 768, 512>}, {pipeline_mode = #tpu.pipeline_mode<synchronous>, transform_indices = @transform_2, window_bounds = array<i64: 1, 512>}, {pipeline_mode = #tpu.pipeline_mode<synchronous>, transform_indices = @transform_3, window_bounds = array<i64: 1, 512>}, {pipeline_mode = #tpu.pipeline_mode<synchronous>, transform_indices = @transform_4, window_bounds = array<i64: 1, 1>}, {transform_indices = @transform_5, window_bounds = array<i64: 8, 1>}]} {
    %c0 = arith.constant 0 : index
    %c0_0 = arith.constant 0 : index
    %0 = vector.load %arg1[%c0, %c0_0] : memref<8x768xbf16, #tpu.memory_space<vmem>>, vector<8x768xbf16>
    %c0_1 = arith.constant 0 : index
    %c0_2 = arith.constant 0 : index
    %1 = vector.load %arg2[%c0_1, %c0_2] : memref<768x512xbf16, #tpu.memory_space<vmem>>, vector<768x512xbf16>
    %cst = arith.constant dense<0.000000e+00> : vector<8x512xf32>
    %2 = tpu.matmul %0, %1, %cst {dimension_numbers = #tpu.dot_dimension_numbers<[1], [0], [0], [1], [0, 0, 1, 1], [], []>} : vector<8x768xbf16>, vector<768x512xbf16>, vector<8x512xf32> -> vector<8x512xf32>
    %c0_3 = arith.constant 0 : index
    %c0_4 = arith.constant 0 : index
    %3 = vector.load %arg3[%c0_3, %c0_4] : memref<1x512xf32, #tpu.memory_space<vmem>>, vector<1x512xf32>
    %4 = vector.broadcast %3 : vector<1x512xf32> to vector<8x512xf32>
    %5 = arith.addf %2, %4 : vector<8x512xf32>
    %cst_5 = arith.constant 0.000000e+00 : f32
    %6 = vector.broadcast %cst_5 : f32 to vector<8x512xf32>
    %7 = arith.maximumf %5, %6 : vector<8x512xf32>
    %c0_6 = arith.constant 0 : index
    %c0_7 = arith.constant 0 : index
    %8 = vector.load %arg4[%c0_6, %c0_7] : memref<1x512xf32, #tpu.memory_space<vmem>>, vector<1x512xf32>
    %9 = vector.broadcast %8 : vector<1x512xf32> to vector<8x512xf32>
    %10 = arith.mulf %7, %9 : vector<8x512xf32>
    %cst_8 = arith.constant dense<0.000000e+00> : vector<8xf32>
    %11 = vector.multi_reduction <add>, %10, %cst_8 [1] : vector<8x512xf32> to vector<8xf32>
    %12 = vector.shape_cast %11 : vector<8xf32> to vector<8x1xf32>
    %c0_9 = arith.constant 0 : index
    %c0_10 = arith.constant 0 : index
    %13 = vector.load %arg5[%c0_9, %c0_10] : memref<1x1xf32, #tpu.memory_space<vmem>>, vector<1x1xf32>
    %14 = vector.broadcast %13 : vector<1x1xf32> to vector<8x1xf32>
    %15 = arith.addf %12, %14 : vector<8x1xf32>
    %cst_11 = arith.constant 0.000000e+00 : f32
    %16 = vector.broadcast %cst_11 : f32 to vector<8x1xf32>
    %17 = arith.subf %16, %15 : vector<8x1xf32>
    %18 = math.exp %17 : vector<8x1xf32>
    %cst_12 = arith.constant 1.000000e+00 : f32
    %19 = vector.broadcast %cst_12 : f32 to vector<8x1xf32>
    %20 = arith.addf %19, %18 : vector<8x1xf32>
    %21 = tpu.reciprocal %20 {approx = true} : vector<8x1xf32> -> vector<8x1xf32>
    %c0_13 = arith.constant 0 : index
    %c0_14 = arith.constant 0 : index
    %22 = vector.load %arg6[%c0_13, %c0_14] : memref<8x1xf32, #tpu.memory_space<vmem>>, vector<8x1xf32>
    tpu.vector_store %arg6[%c0_13, %c0_14], %21 {strides = array<i32>} : memref<8x1xf32, #tpu.memory_space<vmem>>, vector<8x1xf32>,
    return
  }
  func.func @transform_0(%arg0: i32) -> (i32, i32) {
    %c0_i32 = arith.constant 0 : i32
    %c0_i32_0 = arith.constant 0 : i32
    return %arg0, %c0_i32 : i32, i32
  }
  func.func @transform_1(%arg0: i32) -> (i32, i32) {
    %c0_i32 = arith.constant 0 : i32
    %c0_i32_0 = arith.constant 0 : i32
    %c0_i32_1 = arith.constant 0 : i32
    return %c0_i32, %c0_i32_0 : i32, i32
  }
  func.func @transform_2(%arg0: i32) -> (i32, i32) {
    %c0_i32 = arith.constant 0 : i32
    %c0_i32_0 = arith.constant 0 : i32
    %c0_i32_1 = arith.constant 0 : i32
    return %c0_i32, %c0_i32_0 : i32, i32
  }
  func.func @transform_3(%arg0: i32) -> (i32, i32) {
    %c0_i32 = arith.constant 0 : i32
    %c0_i32_0 = arith.constant 0 : i32
    %c0_i32_1 = arith.constant 0 : i32
    return %c0_i32, %c0_i32_0 : i32, i32
  }
  func.func @transform_4(%arg0: i32) -> (i32, i32) {
    %c0_i32 = arith.constant 0 : i32
    %c0_i32_0 = arith.constant 0 : i32
    %c0_i32_1 = arith.constant 0 : i32
    return %c0_i32, %c0_i32_0 : i32, i32
  }
  func.func @transform_5(%arg0: i32) -> (i32, i32) {
    %c0_i32 = arith.constant 0 : i32
    %c0_i32_0 = arith.constant 0 : i32
    return %arg0, %c0_i32 : i32, i32
  }
}

</mosaic_0001>

<bundles_post_ra>
// kernel: tpu_custom_call.1
= control target key start
LH: loop header
LB: loop body
LE: loop exit
PB: predicated region body
PF: predicated region fallthrough
CT: control target
= control target key end

     0   :  { %s2206_s0 = inlined_call_operand.hbm [shape: bf16[8,768], index: 0, kind: input, shape index: {}]   ;;  %s2207_s1 = inlined_call_operand.hbm [shape: bf16[768,512], index: 1, kind: input, shape index: {}]   ;;  %s2208_s2 = inlined_call_operand.vmem [shape: f32[1,512], index: 2, kind: input, shape index: {}]   ;;  %s2209_s3 = inlined_call_operand.vmem [shape: f32[1,512], index: 3, kind: input, shape index: {}]   ;;  %s2210_s4 = inlined_call_operand.<no memory space> [shape: f32[1,1], index: 4, kind: input, shape index: {}]   ;;  %s2211_s5 = inlined_call_operand.vmem [shape: f32[8,1], index: 5, kind: output, shape index: {}]  }
   0x1   :  { %v10_v0 = vstv %s2210_s4 }
   0x2   :  { %11 = vst [vmem:[#allocation2] sm:$0x1] %v10_v0 }
   0x3   :  { %12 = vsyncpa [#allocation4], 0 }
   0x4   :  { %13 = vsyncpa [#allocation6], 0  ;;  %s2117_s20 = smov [#allocation3]   ;;  %s2118_s22 = smov [#allocation5]  }
   0x5   :  { %s20_s21 = sshll.u32 %s2117_s20, 4  ;;  %s29_s23 = sshll.u32 %s2118_s22, 4  ;;  %s21_s21 = int_to_ptr.vmem [resolvable:$true] %s20_s21  ;;  %s2154_s23 = int_to_ptr.vmem [resolvable:$true] %s29_s23 }
   0x6   :  { %s2069_s26 = scalar_lea.hbm %s2206_s0, 384 }
   0x7   :  { %p2070_p0 = scmp.ne.s32.totalorder %s2206_s0, %s2069_s26  ;;  %p2073_p1 = scmp.lt.u32.totalorder %s2069_s26, %s2206_s0 }
   0x9   :  { %p2075_p2 = pnand %p2073_p1, %p2070_p0 }
   0xb   :  { %2078 = shalt.err (!%p2075_p2)
}
   0xc   :  { %s2079_s30 = scalar_lea.vmem %s21_s21, 384  ;;  %p2084_p4 = scmp.lt.s32.totalorder %s21_s21, %s21_s21 }
   0xd   :  { %p2080_p3 = scmp.ne.s32.totalorder %s21_s21, %s2079_s30  ;;  %p2085_p5 = scmp.lt.s32.totalorder %s2079_s30, %s2079_s30 }
   0xf   :  { %p2086_p6 = por %p2085_p5, %p2084_p4 }
  0x11   :  { %p2087_p7 = pnand %p2086_p6, %p2080_p3 }
  0x13   :  { %2090 = shalt.err (!%p2087_p7)
}
  0x14   :  { %23 = dma.hbm_to_vmem [thread:$0]  %s2206_s0, 384, %s21_s21, [#allocation4]  }
  0x15   :  { %s2091_s10 = scalar_lea.hbm %s2207_s1, 24576 }
  0x16   :  { %p2092_p8 = scmp.ne.s32.totalorder %s2207_s1, %s2091_s10  ;;  %p2095_p9 = scmp.lt.u32.totalorder %s2091_s10, %s2207_s1 }
  0x18   :  { %p2097_p10 = pnand %p2095_p9, %p2092_p8 }
  0x1a   :  { %2100 = shalt.err (!%p2097_p10)
}
  0x1b   :  { %s2101_s15 = scalar_lea.vmem %s2154_s23, 24576  ;;  %p2106_p12 = scmp.lt.s32.totalorder %s2154_s23, %s2154_s23 }
  0x1c   :  { %p2102_p11 = scmp.ne.s32.totalorder %s2154_s23, %s2101_s15  ;;  %p2107_p13 = scmp.lt.s32.totalorder %s2101_s15, %s2101_s15 }
  0x1e   :  { %p2108_p0 = por %p2107_p13, %p2106_p12 }
  0x20   :  { %p2109_p1 = pnand %p2108_p0, %p2102_p11 }
  0x22   :  { %2112 = shalt.err (!%p2109_p1)
}
  0x23   :  { %s2119_s0 = smov 256   ;;  %s2120_s16 = smov 16  }
  0x24   :  { %35 = dma.hbm_to_vmem [thread:$0]  %s2207_s1, 24576, %s2154_s23, [#allocation6], %s2119_s0, %s2119_s0, %s2120_s16  }
  0x25   :  { %2113 = dma.done.wait [#allocation4], 384  }
  0x26   :  { %2114 = vsyncadd [#allocation4], 4294966912 }
  0x27   :  { %2115 = dma.done.wait [#allocation6], 24576  }
  0x28   :  { %2116 = vsyncadd [#allocation6], 4294942720  ;;  %v1771_v1 = vld [vmem:[#allocation5 + $0x4] ss:$16 sps:$4 sm:$0xff]   ;;  %v1773_v2 = vld [vmem:[#allocation5 + $0xc] ss:$16 sps:$4 sm:$0xff]  }
  0x29   :  { %1246 = vmatprep.subr.bf16.mxu0 %v1771_v1  ;;  %v1775_v3 = vld [vmem:[#allocation5] ss:$16 sps:$4 sm:$0xff]   ;;  %v1776_v4 = vld [vmem:[#allocation5 + $0x8] ss:$16 sps:$4 sm:$0xff]   ;;  %1369 = vmatprep.subr.bf16.mxu1 %v1773_v2  ;;  %v1777_v5 = vld [vmem:[#allocation5 + $0x24] ss:$16 sps:$4 sm:$0xff]  }
  0x2a   :  { %1247 = vmatpush1.bf16.msra.mxu0 %v1775_v3  ;;  %1370 = vmatpush1.bf16.msra.mxu1 %v1776_v4  ;;  %v1779_v6 = vld [vmem:[#allocation5 + $0x2c] ss:$16 sps:$4 sm:$0xff]   ;;  %v1781_v7 = vld [vmem:[#allocation5 + $0x20] ss:$16 sps:$4 sm:$0xff]   ;;  %v1782_v8 = vld [vmem:[#allocation5 + $0x28] ss:$16 sps:$4 sm:$0xff]  }
  0x2b   :  { %1248 = vmatprep.subr.bf16.mxu0 %v1777_v5  ;;  %1371 = vmatprep.subr.bf16.mxu1 %v1779_v6  ;;  %v1783_v9 = vld [vmem:[#allocation5 + $0x44] ss:$16 sps:$4 sm:$0xff]   ;;  %v1785_v10 = vld [vmem:[#allocation5 + $0x4c] ss:$16 sps:$4 sm:$0xff]   ;;  %v1787_v11 = vld [vmem:[#allocation5 + $0x40] ss:$16 sps:$4 sm:$0xff]  }
  0x2c   :  { %v1788_v12 = vld [vmem:[#allocation5 + $0x48] ss:$16 sps:$4 sm:$0xff]   ;;  %v1789_v13 = vld [vmem:[#allocation5 + $0x64] ss:$16 sps:$4 sm:$0xff]   ;;  %v1791_v14 = vld [vmem:[#allocation5 + $0x6c] ss:$16 sps:$4 sm:$0xff]  }
  0x2d   :  { %v1793_v15 = vld [vmem:[#allocation5 + $0x60] ss:$16 sps:$4 sm:$0xff]   ;;  %v1794_v16 = vld [vmem:[#allocation5 + $0x68] ss:$16 sps:$4 sm:$0xff]   ;;  %v1795_v17 = vld [vmem:[#allocation5 + $0x84] ss:$16 sps:$4 sm:$0xff]  }
  0x2e   :  { %1249 = vmatpush1.bf16.msra.mxu0 %v1781_v7  ;;  %1372 = vmatpush1.bf16.msra.mxu1 %v1782_v8  ;;  %v1797_v18 = vld [vmem:[#allocation5 + $0x8c] ss:$16 sps:$4 sm:$0xff]   ;;  %v1799_v19 = vld [vmem:[#allocation5 + $0x80] ss:$16 sps:$4 sm:$0xff]   ;;  %v1800_v20 = vld [vmem:[#allocation5 + $0x88] ss:$16 sps:$4 sm:$0xff]  }
  0x2f   :  { %1250 = vmatprep.subr.bf16.mxu0 %v1783_v9  ;;  %1373 = vmatprep.subr.bf16.mxu1 %v1785_v10  ;;  %v1801_v21 = vld [vmem:[#allocation5 + $0xa4] ss:$16 sps:$4 sm:$0xff]   ;;  %v1803_v22 = vld [vmem:[#allocation5 + $0xac] ss:$16 sps:$4 sm:$0xff]   ;;  %v1805_v23 = vld [vmem:[#allocation5 + $0xa0] ss:$16 sps:$4 sm:$0xff]  }
  0x30   :  { %v1806_v24 = vld [vmem:[#allocation5 + $0xa8] ss:$16 sps:$4 sm:$0xff]   ;;  %v1807_v25 = vld [vmem:[#allocation5 + $0xc4] ss:$16 sps:$4 sm:$0xff]   ;;  %v1809_v26 = vld [vmem:[#allocation5 + $0xcc] ss:$16 sps:$4 sm:$0xff]  }
  0x31   :  { %v1811_v27 = vld [vmem:[#allocation5 + $0xc0] ss:$16 sps:$4 sm:$0xff]   ;;  %v1812_v28 = vld [vmem:[#allocation5 + $0xc8] ss:$16 sps:$4 sm:$0xff]   ;;  %v1813_v29 = vld [vmem:[#allocation5 + $0xe4] ss:$16 sps:$4 sm:$0xff]  }
  0x32   :  { %1251 = vmatpush1.bf16.msra.mxu0 %v1787_v11  ;;  %1374 = vmatpush1.bf16.msra.mxu1 %v1788_v12  ;;  %v1815_v30 = vld [vmem:[#allocation5 + $0xec] ss:$16 sps:$4 sm:$0xff]   ;;  %v1817_v31 = vld [vmem:[#allocation5 + $0xe0] ss:$16 sps:$4 sm:$0xff]   ;;  %v1818_v32 = vld [vmem:[#allocation5 + $0xe8] ss:$16 sps:$4 sm:$0xff]  }
  0x33   :  { %1252 = vmatprep.subr.bf16.mxu0 %v1789_v13  ;;  %1375 = vmatprep.subr.bf16.mxu1 %v1791_v14  ;;  %v1819_v33 = vld [vmem:[#allocation5 + $0x104] ss:$16 sps:$4 sm:$0xff]   ;;  %v1821_v34 = vld [vmem:[#allocation5 + $0x10c] ss:$16 sps:$4 sm:$0xff]   ;;  %v1823_v35 = vld [vmem:[#allocation5 + $0x100] ss:$16 sps:$4 sm:$0xff]  }
  0x34   :  { %v1824_v36 = vld [vmem:[#allocation5 + $0x108] ss:$16 sps:$4 sm:$0xff]   ;;  %v1825_v37 = vld [vmem:[#allocation5 + $0x124] ss:$16 sps:$4 sm:$0xff]   ;;  %v1827_v38 = vld [vmem:[#allocation5 + $0x12c] ss:$16 sps:$4 sm:$0xff]  }
  0x35   :  { %v1829_v39 = vld [vmem:[#allocation5 + $0x120] ss:$16 sps:$4 sm:$0xff]   ;;  %v1830_v40 = vld [vmem:[#allocation5 + $0x128] ss:$16 sps:$4 sm:$0xff]   ;;  %v1831_v41 = vld [vmem:[#allocation5 + $0x144] ss:$16 sps:$4 sm:$0xff]  }
  0x36   :  { %1253 = vmatpush1.bf16.msra.mxu0 %v1793_v15  ;;  %1376 = vmatpush1.bf16.msra.mxu1 %v1794_v16  ;;  %v1833_v42 = vld [vmem:[#allocation5 + $0x14c] ss:$16 sps:$4 sm:$0xff]   ;;  %v1835_v43 = vld [vmem:[#allocation5 + $0x140] ss:$16 sps:$4 sm:$0xff]   ;;  %v1836_v44 = vld [vmem:[#allocation5 + $0x148] ss:$16 sps:$4 sm:$0xff]  }
  0x37   :  { %1254 = vmatprep.subr.bf16.mxu0 %v1795_v17  ;;  %1377 = vmatprep.subr.bf16.mxu1 %v1797_v18  ;;  %v1837_v45 = vld [vmem:[#allocation5 + $0x164] ss:$16 sps:$4 sm:$0xff]   ;;  %v1839_v46 = vld [vmem:[#allocation5 + $0x16c] ss:$16 sps:$4 sm:$0xff]   ;;  %v1841_v48 = vld [vmem:[#allocation5 + $0x160] ss:$16 sps:$4 sm:$0xff]  }
  0x38   :  { %v48_v47 = vld [vmem:[#allocation3] sm:$0xff]  ;;  %v1843_v51 = vld [vmem:[#allocation5 + $0x184] ss:$16 sps:$4 sm:$0xff]   ;;  %v1847_v53 = vld [vmem:[#allocation5 + $0x180] ss:$16 sps:$4 sm:$0xff]   ;;  %vm1540_vm0 = vcmask 7168  }
  0x39   :  { %v1549_v49 = vcombine.high %v48_v47, %v48_v47  ;;  %v1842_v50 = vld [vmem:[#allocation5 + $0x168] ss:$16 sps:$4 sm:$0xff]   ;;  %v1845_v52 = vld [vmem:[#allocation5 + $0x18c] ss:$16 sps:$4 sm:$0xff]   ;;  %v1849_v55 = vld [vmem:[#allocation5 + $0x1a4] ss:$16 sps:$4 sm:$0xff]   ;;  %v1548_v5 = vcombine.low %v48_v47, %v48_v47 }
  0x3a   :  { %1255 = vmatpush1.bf16.msra.mxu0 %v1799_v19  ;;  %1378 = vmatpush1.bf16.msra.mxu1 %v1800_v20  ;;  %v1848_v54 = vld [vmem:[#allocation5 + $0x188] ss:$16 sps:$4 sm:$0xff]   ;;  %v1851_v56 = vld [vmem:[#allocation5 + $0x1ac] ss:$16 sps:$4 sm:$0xff]   ;;  %v1853_v57 = vld [vmem:[#allocation5 + $0x1a0] ss:$16 sps:$4 sm:$0xff]  }
  0x3b   :  { %1256 = vmatprep.subr.bf16.mxu0 %v1801_v21  ;;  %1379 = vmatprep.subr.bf16.mxu1 %v1803_v22  ;;  %v1854_v58 = vld [vmem:[#allocation5 + $0x1a8] ss:$16 sps:$4 sm:$0xff]   ;;  %v1855_v59 = vld [vmem:[#allocation5 + $0x1c4] ss:$16 sps:$4 sm:$0xff]   ;;  %v1857_v60 = vld [vmem:[#allocation5 + $0x1cc] ss:$16 sps:$4 sm:$0xff]  }
  0x3c   :  { %1278 = vmatprep.mubr.bf16.mxu0 %v1549_v49  ;;  %1401 = vmatprep.mubr.bf16.mxu1 %v1549_v49  ;;  %v1859_v61 = vld [vmem:[#allocation5 + $0x1c0] ss:$16 sps:$4 sm:$0xff]   ;;  %v1860_v62 = vld [vmem:[#allocation5 + $0x1c8] ss:$16 sps:$4 sm:$0xff]   ;;  %v1861_v63 = vld [vmem:[#allocation5 + $0x1e4] ss:$16 sps:$4 sm:$0xff]  }
  0x3d   :  { %v1863_v0 = vld [vmem:[#allocation5 + $0x1ec] ss:$16 sps:$4 sm:$0xff]   ;;  %v1865_v1 = vld [vmem:[#allocation5 + $0x1e0] ss:$16 sps:$4 sm:$0xff]   ;;  %v1866_v2 = vld [vmem:[#allocation5 + $0x1e8] ss:$16 sps:$4 sm:$0xff]  }
  0x3e   :  { %1257 = vmatpush1.bf16.msra.mxu0 %v1805_v23  ;;  %1380 = vmatpush1.bf16.msra.mxu1 %v1806_v24  ;;  %v1871_v3 = vld [vmem:[#allocation5 + $0x204] ss:$16 sps:$4 sm:$0xff]   ;;  %v1874_v4 = vld [vmem:[#allocation5 + $0x20c] ss:$16 sps:$4 sm:$0xff]   ;;  %v1869_v6 = vld [vmem:[#allocation5 + $0x200] ss:$16 sps:$4 sm:$0xff]  }
  0x3f   :  { %1258 = vmatprep.subr.bf16.mxu0 %v1807_v25  ;;  %1381 = vmatprep.subr.bf16.mxu1 %v1809_v26  ;;  %v1872_v7 = vld [vmem:[#allocation5 + $0x208] ss:$16 sps:$4 sm:$0xff]   ;;  %v1877_v8 = vld [vmem:[#allocation5 + $0x224] ss:$16 sps:$4 sm:$0xff]   ;;  %v1880_v9 = vld [vmem:[#allocation5 + $0x22c] ss:$16 sps:$4 sm:$0xff]  }
  0x40   :  { %v1875_v10 = vld [vmem:[#allocation5 + $0x220] ss:$16 sps:$4 sm:$0xff]   ;;  %v1878_v11 = vld [vmem:[#allocation5 + $0x228] ss:$16 sps:$4 sm:$0xff]   ;;  %v1883_v12 = vld [vmem:[#allocation5 + $0x244] ss:$16 sps:$4 sm:$0xff]  }
  0x41   :  { %v1886_v13 = vld [vmem:[#allocation5 + $0x24c] ss:$16 sps:$4 sm:$0xff]   ;;  %v1881_v14 = vld [vmem:[#allocation5 + $0x240] ss:$16 sps:$4 sm:$0xff]   ;;  %v1884_v15 = vld [vmem:[#allocation5 + $0x248] ss:$16 sps:$4 sm:$0xff]  }
  0x42   :  { %1259 = vmatpush1.bf16.msra.mxu0 %v1811_v27  ;;  %1382 = vmatpush1.bf16.msra.mxu1 %v1812_v28  ;;  %v1889_v16 = vld [vmem:[#allocation5 + $0x264] ss:$16 sps:$4 sm:$0xff]   ;;  %v1892_v17 = vld [vmem:[#allocation5 + $0x26c] ss:$16 sps:$4 sm:$0xff]   ;;  %v1887_v18 = vld [vmem:[#allocation5 + $0x260] ss:$16 sps:$4 sm:$0xff]  }
  0x43   :  { %1260 = vmatprep.subr.bf16.mxu0 %v1813_v29  ;;  %1383 = vmatprep.subr.bf16.mxu1 %v1815_v30  ;;  %v1890_v19 = vld [vmem:[#allocation5 + $0x268] ss:$16 sps:$4 sm:$0xff]   ;;  %v1895_v20 = vld [vmem:[#allocation5 + $0x284] ss:$16 sps:$4 sm:$0xff]   ;;  %v1898_v21 = vld [vmem:[#allocation5 + $0x28c] ss:$16 sps:$4 sm:$0xff]  }
  0x44   :  { %v1893_v22 = vld [vmem:[#allocation5 + $0x280] ss:$16 sps:$4 sm:$0xff]   ;;  %v1896_v23 = vld [vmem:[#allocation5 + $0x288] ss:$16 sps:$4 sm:$0xff]   ;;  %v1901_v24 = vld [vmem:[#allocation5 + $0x2a4] ss:$16 sps:$4 sm:$0xff]  }
  0x45   :  { %v1904_v25 = vld [vmem:[#allocation5 + $0x2ac] ss:$16 sps:$4 sm:$0xff]   ;;  %v1899_v26 = vld [vmem:[#allocation5 + $0x2a0] ss:$16 sps:$4 sm:$0xff]   ;;  %v1902_v27 = vld [vmem:[#allocation5 + $0x2a8] ss:$16 sps:$4 sm:$0xff]  }
  0x46   :  { %1261 = vmatpush1.bf16.msra.mxu0 %v1817_v31  ;;  %1384 = vmatpush1.bf16.msra.mxu1 %v1818_v32  ;;  %v1907_v28 = vld [vmem:[#allocation5 + $0x2c4] ss:$16 sps:$4 sm:$0xff]   ;;  %v1910_v29 = vld [vmem:[#allocation5 + $0x2cc] ss:$16 sps:$4 sm:$0xff]   ;;  %v1905_v32 = vld [vmem:[#allocation5 + $0x2c0] ss:$16 sps:$4 sm:$0xff]  }
  0x47   :  { %1262 = vmatprep.subr.bf16.mxu0 %v1819_v33  ;;  %1385 = vmatprep.subr.bf16.mxu1 %v1821_v34  ;;  %v2185_v30 = vld [vmem:[#allocation3 + $0x8] sm:$0xff]  ;;  %v1908_v33 = vld [vmem:[#allocation5 + $0x2c8] ss:$16 sps:$4 sm:$0xff]   ;;  %v1934_v47 = vld [vmem:[#allocation5 + $0x34c] ss:$16 sps:$4 sm:$0xff]  }
  0x48   :  { %v1551_v31 = vcombine.high %v2185_v30, %v2185_v30  ;;  %v1913_v34 = vld [vmem:[#allocation5 + $0x2e4] ss:$16 sps:$4 sm:$0xff]   ;;  %v1932_v49 = vld [vmem:[#allocation5 + $0x348] ss:$16 sps:$4 sm:$0xff]  }
  0x4a   :  { %1263 = vmatpush1.bf16.msra.mxu0 %v1823_v35  ;;  %1386 = vmatpush1.bf16.msra.mxu1 %v1824_v36  ;;  %v1916_v35 = vld [vmem:[#allocation5 + $0x2ec] ss:$16 sps:$4 sm:$0xff]   ;;  %v1911_v36 = vld [vmem:[#allocation5 + $0x2e0] ss:$16 sps:$4 sm:$0xff]  }
  0x4b   :  { %1264 = vmatprep.subr.bf16.mxu0 %v1825_v37  ;;  %1387 = vmatprep.subr.bf16.mxu1 %v1827_v38  ;;  %v1914_v37 = vld [vmem:[#allocation5 + $0x2e8] ss:$16 sps:$4 sm:$0xff]   ;;  %v1919_v38 = vld [vmem:[#allocation5 + $0x304] ss:$16 sps:$4 sm:$0xff]  }
  0x4e   :  { %1265 = vmatpush1.bf16.msra.mxu0 %v1829_v39  ;;  %1388 = vmatpush1.bf16.msra.mxu1 %v1830_v40  ;;  %v1922_v39 = vld [vmem:[#allocation5 + $0x30c] ss:$16 sps:$4 sm:$0xff]   ;;  %v1917_v40 = vld [vmem:[#allocation5 + $0x300] ss:$16 sps:$4 sm:$0xff]  }
  0x4f   :  { %1266 = vmatprep.subr.bf16.mxu0 %v1831_v41  ;;  %1389 = vmatprep.subr.bf16.mxu1 %v1833_v42  ;;  %v1920_v41 = vld [vmem:[#allocation5 + $0x308] ss:$16 sps:$4 sm:$0xff]   ;;  %v1925_v42 = vld [vmem:[#allocation5 + $0x324] ss:$16 sps:$4 sm:$0xff]  }
  0x52   :  { %1267 = vmatpush1.bf16.msra.mxu0 %v1835_v43  ;;  %1390 = vmatpush1.bf16.msra.mxu1 %v1836_v44  ;;  %v1928_v43 = vld [vmem:[#allocation5 + $0x32c] ss:$16 sps:$4 sm:$0xff]   ;;  %v1923_v44 = vld [vmem:[#allocation5 + $0x320] ss:$16 sps:$4 sm:$0xff]  }
  0x53   :  { %1268 = vmatprep.subr.bf16.mxu0 %v1837_v45  ;;  %1391 = vmatprep.subr.bf16.mxu1 %v1839_v46  ;;  %v1926_v45 = vld [vmem:[#allocation5 + $0x328] ss:$16 sps:$4 sm:$0xff]   ;;  %v1931_v46 = vld [vmem:[#allocation5 + $0x344] ss:$16 sps:$4 sm:$0xff]  }
  0x56   :  { %1269 = vmatpush1.bf16.msra.mxu0 %v1841_v48  ;;  %1392 = vmatpush1.bf16.msra.mxu1 %v1842_v50  ;;  %v1929_v48 = vld [vmem:[#allocation5 + $0x340] ss:$16 sps:$4 sm:$0xff]   ;;  %v1937_v50 = vld [vmem:[#allocation5 + $0x364] ss:$16 sps:$4 sm:$0xff]  }
  0x57   :  { %1270 = vmatprep.subr.bf16.mxu0 %v1843_v51  ;;  %1393 = vmatprep.subr.bf16.mxu1 %v1845_v52  ;;  %v1940_v51 = vld [vmem:[#allocation5 + $0x36c] ss:$16 sps:$4 sm:$0xff]   ;;  %v1935_v52 = vld [vmem:[#allocation5 + $0x360] ss:$16 sps:$4 sm:$0xff]  }
  0x5a   :  { %1271 = vmatpush1.bf16.msra.mxu0 %v1847_v53  ;;  %1394 = vmatpush1.bf16.msra.mxu1 %v1848_v54  ;;  %v1938_v53 = vld [vmem:[#allocation5 + $0x368] ss:$16 sps:$4 sm:$0xff]   ;;  %v1943_v54 = vld [vmem:[#allocation5 + $0x384] ss:$16 sps:$4 sm:$0xff]  }
  0x5b   :  { %1272 = vmatprep.subr.bf16.mxu0 %v1849_v55  ;;  %1395 = vmatprep.subr.bf16.mxu1 %v1851_v56  ;;  %v1946_v55 = vld [vmem:[#allocation5 + $0x38c] ss:$16 sps:$4 sm:$0xff]   ;;  %v1941_v56 = vld [vmem:[#allocation5 + $0x380] ss:$16 sps:$4 sm:$0xff]  }
  0x5e   :  { %1273 = vmatpush1.bf16.msra.mxu0 %v1853_v57  ;;  %1396 = vmatpush1.bf16.msra.mxu1 %v1854_v58  ;;  %v1944_v57 = vld [vmem:[#allocation5 + $0x388] ss:$16 sps:$4 sm:$0xff]   ;;  %v1949_v58 = vld [vmem:[#allocation5 + $0x3a4] ss:$16 sps:$4 sm:$0xff]  }
  0x5f   :  { %1274 = vmatprep.subr.bf16.mxu0 %v1855_v59  ;;  %1397 = vmatprep.subr.bf16.mxu1 %v1857_v60  ;;  %v1952_v59 = vld [vmem:[#allocation5 + $0x3ac] ss:$16 sps:$4 sm:$0xff]   ;;  %v1947_v60 = vld [vmem:[#allocation5 + $0x3a0] ss:$16 sps:$4 sm:$0xff]  }
  0x62   :  { %1275 = vmatpush1.bf16.msra.mxu0 %v1859_v61  ;;  %1398 = vmatpush1.bf16.msra.mxu1 %v1860_v62  ;;  %v1950_v61 = vld [vmem:[#allocation5 + $0x3a8] ss:$16 sps:$4 sm:$0xff]   ;;  %v1955_v62 = vld [vmem:[#allocation5 + $0x3c4] ss:$16 sps:$4 sm:$0xff]  }
  0x63   :  { %1276 = vmatprep.subr.bf16.mxu0 %v1861_v63  ;;  %1399 = vmatprep.subr.bf16.mxu1 %v1863_v0  ;;  %v1958_v63 = vld [vmem:[#allocation5 + $0x3cc] ss:$16 sps:$4 sm:$0xff]   ;;  %v1953_v0 = vld [vmem:[#allocation5 + $0x3c0] ss:$16 sps:$4 sm:$0xff]  }
  0x66   :  { %1277 = vmatpush1.bf16.msra.mxu0 %v1865_v1  ;;  %1400 = vmatpush1.bf16.msra.mxu1 %v1866_v2  ;;  %v1956_v1 = vld [vmem:[#allocation5 + $0x3c8] ss:$16 sps:$4 sm:$0xff]   ;;  %v1961_v2 = vld [vmem:[#allocation5 + $0x3e4] ss:$16 sps:$4 sm:$0xff]  }
  0x67   :  { %1287 = vmatprep.subr.bf16.mxu0 %v1871_v3  ;;  %1410 = vmatprep.subr.bf16.mxu1 %v1874_v4  ;;  %v1964_v3 = vld [vmem:[#allocation5 + $0x3ec] ss:$16 sps:$4 sm:$0xff]   ;;  %v1959_v4 = vld [vmem:[#allocation5 + $0x3e0] ss:$16 sps:$4 sm:$0xff]  }
  0x69   :  { %1279 = vmatmul.mubr.bf16.vlgmr.msra.gmra.mrb[0].mxu0 %v1548_v5  ;;  %1402 = vmatmul.mubr.bf16.vlgmr.msra.gmra.mrb[0].mxu1 %v1548_v5  ;;  %v1962_v5 = vld [vmem:[#allocation5 + $0x3e8] ss:$16 sps:$4 sm:$0xff]  }
  0x6a   :  { %1288 = vmatpush1.bf16.msra.mxu0 %v1869_v6  ;;  %1411 = vmatpush1.bf16.msra.mxu1 %v1872_v7  ;;  %v1969_v6 = vld [vmem:[#allocation5 + $0x404] ss:$16 sps:$4 sm:$0xff]   ;;  %v1972_v7 = vld [vmem:[#allocation5 + $0x40c] ss:$16 sps:$4 sm:$0xff]  }
  0x6b   :  { %1289 = vmatprep.subr.bf16.mxu0 %v1877_v8  ;;  %1412 = vmatprep.subr.bf16.mxu1 %v1880_v9  ;;  %v1550_v8 = vcombine.low %v2185_v30, %v2185_v30  ;;  %v1967_v9 = vld [vmem:[#allocation5 + $0x400] ss:$16 sps:$4 sm:$0xff]   ;;  %v2002_v30 = vld [vmem:[#allocation5 + $0x4ac] ss:$16 sps:$4 sm:$0xff]  }
  0x6c   :  { %1319 = vmatprep.mubr.bf16.mxu0 %v1551_v31  ;;  %1442 = vmatprep.mubr.bf16.mxu1 %v1551_v31  ;;  %v1997_v31 = vld [vmem:[#allocation5 + $0x4a0] ss:$16 sps:$4 sm:$0xff]  }
  0x6e   :  { %1290 = vmatpush1.bf16.msra.mxu0 %v1875_v10  ;;  %1413 = vmatpush1.bf16.msra.mxu1 %v1878_v11  ;;  %v1970_v10 = vld [vmem:[#allocation5 + $0x408] ss:$16 sps:$4 sm:$0xff]  }
  0x6f   :  { %1291 = vmatprep.subr.bf16.mxu0 %v1883_v12  ;;  %1414 = vmatprep.subr.bf16.mxu1 %v1886_v13  ;;  %v2191_v11 = vld [vmem:[#allocation3 + $0x10] sm:$0xff]  ;;  %v1975_v12 = vld [vmem:[#allocation5 + $0x424] ss:$16 sps:$4 sm:$0xff]  }
  0x70   :  { %v1978_v13 = vld [vmem:[#allocation5 + $0x42c] ss:$16 sps:$4 sm:$0xff]  }
  0x72   :  { %1292 = vmatpush1.bf16.msra.mxu0 %v1881_v14  ;;  %1415 = vmatpush1.bf16.msra.mxu1 %v1884_v15  ;;  %v1553_v14 = vcombine.high %v2191_v11, %v2191_v11  ;;  %v1973_v15 = vld [vmem:[#allocation5 + $0x420] ss:$16 sps:$4 sm:$0xff]  }
  0x73   :  { %1293 = vmatprep.subr.bf16.mxu0 %v1889_v16  ;;  %1416 = vmatprep.subr.bf16.mxu1 %v1892_v17  ;;  %v1976_v16 = vld [vmem:[#allocation5 + $0x428] ss:$16 sps:$4 sm:$0xff]   ;;  %v1981_v17 = vld [vmem:[#allocation5 + $0x444] ss:$16 sps:$4 sm:$0xff]  }
  0x76   :  { %1294 = vmatpush1.bf16.msra.mxu0 %v1887_v18  ;;  %1417 = vmatpush1.bf16.msra.mxu1 %v1890_v19  ;;  %v1984_v18 = vld [vmem:[#allocation5 + $0x44c] ss:$16 sps:$4 sm:$0xff]   ;;  %v1979_v19 = vld [vmem:[#allocation5 + $0x440] ss:$16 sps:$4 sm:$0xff]  }
  0x77   :  { %1295 = vmatprep.subr.bf16.mxu0 %v1895_v20  ;;  %1418 = vmatprep.subr.bf16.mxu1 %v1898_v21  ;;  %v1982_v20 = vld [vmem:[#allocation5 + $0x448] ss:$16 sps:$4 sm:$0xff]   ;;  %v1987_v21 = vld [vmem:[#allocation5 + $0x464] ss:$16 sps:$4 sm:$0xff]  }
  0x7a   :  { %1296 = vmatpush1.bf16.msra.mxu0 %v1893_v22  ;;  %1419 = vmatpush1.bf16.msra.mxu1 %v1896_v23  ;;  %v1990_v22 = vld [vmem:[#allocation5 + $0x46c] ss:$16 sps:$4 sm:$0xff]   ;;  %v1985_v23 = vld [vmem:[#allocation5 + $0x460] ss:$16 sps:$4 sm:$0xff]  }
  0x7b   :  { %1297 = vmatprep.subr.bf16.mxu0 %v1901_v24  ;;  %1420 = vmatprep.subr.bf16.mxu1 %v1904_v25  ;;  %v1988_v24 = vld [vmem:[#allocation5 + $0x468] ss:$16 sps:$4 sm:$0xff]   ;;  %v1993_v25 = vld [vmem:[#allocation5 + $0x484] ss:$16 sps:$4 sm:$0xff]  }
  0x7e   :  { %1298 = vmatpush1.bf16.msra.mxu0 %v1899_v26  ;;  %1421 = vmatpush1.bf16.msra.mxu1 %v1902_v27  ;;  %v1996_v26 = vld [vmem:[#allocation5 + $0x48c] ss:$16 sps:$4 sm:$0xff]   ;;  %v1991_v27 = vld [vmem:[#allocation5 + $0x480] ss:$16 sps:$4 sm:$0xff]  }
  0x7f   :  { %1299 = vmatprep.subr.bf16.mxu0 %v1907_v28  ;;  %1422 = vmatprep.subr.bf16.mxu1 %v1910_v29  ;;  %v1994_v28 = vld [vmem:[#allocation5 + $0x488] ss:$16 sps:$4 sm:$0xff]   ;;  %v1999_v29 = vld [vmem:[#allocation5 + $0x4a4] ss:$16 sps:$4 sm:$0xff]  }
  0x82   :  { %1300 = vmatpush1.bf16.msra.mxu0 %v1905_v32  ;;  %1423 = vmatpush1.bf16.msra.mxu1 %v1908_v33  ;;  %v2000_v32 = vld [vmem:[#allocation5 + $0x4a8] ss:$16 sps:$4 sm:$0xff]   ;;  %v2005_v33 = vld [vmem:[#allocation5 + $0x4c4] ss:$16 sps:$4 sm:$0xff]  }
  0x83   :  { %1301 = vmatprep.subr.bf16.mxu0 %v1913_v34  ;;  %1424 = vmatprep.subr.bf16.mxu1 %v1916_v35  ;;  %v2008_v34 = vld [vmem:[#allocation5 + $0x4cc] ss:$16 sps:$4 sm:$0xff]   ;;  %v2003_v35 = vld [vmem:[#allocation5 + $0x4c0] ss:$16 sps:$4 sm:$0xff]  }
  0x86   :  { %1302 = vmatpush1.bf16.msra.mxu0 %v1911_v36  ;;  %1425 = vmatpush1.bf16.msra.mxu1 %v1914_v37  ;;  %v2006_v36 = vld [vmem:[#allocation5 + $0x4c8] ss:$16 sps:$4 sm:$0xff]   ;;  %v2011_v37 = vld [vmem:[#allocation5 + $0x4e4] ss:$16 sps:$4 sm:$0xff]  }
  0x87   :  { %1303 = vmatprep.subr.bf16.mxu0 %v1919_v38  ;;  %1426 = vmatprep.subr.bf16.mxu1 %v1922_v39  ;;  %v2014_v38 = vld [vmem:[#allocation5 + $0x4ec] ss:$16 sps:$4 sm:$0xff]   ;;  %v2009_v39 = vld [vmem:[#allocation5 + $0x4e0] ss:$16 sps:$4 sm:$0xff]  }
  0x8a   :  { %1304 = vmatpush1.bf16.msra.mxu0 %v1917_v40  ;;  %1427 = vmatpush1.bf16.msra.mxu1 %v1920_v41  ;;  %v2012_v40 = vld [vmem:[#allocation5 + $0x4e8] ss:$16 sps:$4 sm:$0xff]   ;;  %v2017_v41 = vld [vmem:[#allocation5 + $0x504] ss:$16 sps:$4 sm:$0xff]  }
  0x8b   :  { %1305 = vmatprep.subr.bf16.mxu0 %v1925_v42  ;;  %1428 = vmatprep.subr.bf16.mxu1 %v1928_v43  ;;  %v2020_v42 = vld [vmem:[#allocation5 + $0x50c] ss:$16 sps:$4 sm:$0xff]   ;;  %v2015_v43 = vld [vmem:[#allocation5 + $0x500] ss:$16 sps:$4 sm:$0xff]  }
  0x8e   :  { %1306 = vmatpush1.bf16.msra.mxu0 %v1923_v44  ;;  %1429 = vmatpush1.bf16.msra.mxu1 %v1926_v45  ;;  %v2018_v44 = vld [vmem:[#allocation5 + $0x508] ss:$16 sps:$4 sm:$0xff]   ;;  %v2023_v45 = vld [vmem:[#allocation5 + $0x524] ss:$16 sps:$4 sm:$0xff]  }
  0x8f   :  { %1307 = vmatprep.subr.bf16.mxu0 %v1931_v46  ;;  %1430 = vmatprep.subr.bf16.mxu1 %v1934_v47  ;;  %v2026_v46 = vld [vmem:[#allocation5 + $0x52c] ss:$16 sps:$4 sm:$0xff]   ;;  %v2021_v47 = vld [vmem:[#allocation5 + $0x520] ss:$16 sps:$4 sm:$0xff]  }
  0x92   :  { %1308 = vmatpush1.bf16.msra.mxu0 %v1929_v48  ;;  %1431 = vmatpush1.bf16.msra.mxu1 %v1932_v49  ;;  %v2024_v48 = vld [vmem:[#allocation5 + $0x528] ss:$16 sps:$4 sm:$0xff]   ;;  %v2029_v49 = vld [vmem:[#allocation5 + $0x544] ss:$16 sps:$4 sm:$0xff]  }
  0x93   :  { %1309 = vmatprep.subr.bf16.mxu0 %v1937_v50  ;;  %1432 = vmatprep.subr.bf16.mxu1 %v1940_v51  ;;  %v2032_v50 = vld [vmem:[#allocation5 + $0x54c] ss:$16 sps:$4 sm:$0xff]   ;;  %v2027_v51 = vld [vmem:[#allocation5 + $0x540] ss:$16 sps:$4 sm:$0xff]  }
  0x96   :  { %1310 = vmatpush1.bf16.msra.mxu0 %v1935_v52  ;;  %1433 = vmatpush1.bf16.msra.mxu1 %v1938_v53  ;;  %v2030_v52 = vld [vmem:[#allocation5 + $0x548] ss:$16 sps:$4 sm:$0xff]   ;;  %v2035_v53 = vld [vmem:[#allocation5 + $0x564] ss:$16 sps:$4 sm:$0xff]  }
  0x97   :  { %1311 = vmatprep.subr.bf16.mxu0 %v1943_v54  ;;  %1434 = vmatprep.subr.bf16.mxu1 %v1946_v55  ;;  %v2038_v54 = vld [vmem:[#allocation5 + $0x56c] ss:$16 sps:$4 sm:$0xff]   ;;  %v2033_v55 = vld [vmem:[#allocation5 + $0x560] ss:$16 sps:$4 sm:$0xff]  }
  0x9a   :  { %1312 = vmatpush1.bf16.msra.mxu0 %v1941_v56  ;;  %1435 = vmatpush1.bf16.msra.mxu1 %v1944_v57  ;;  %v2036_v56 = vld [vmem:[#allocation5 + $0x568] ss:$16 sps:$4 sm:$0xff]   ;;  %v2041_v57 = vld [vmem:[#allocation5 + $0x584] ss:$16 sps:$4 sm:$0xff]  }
  0x9b   :  { %1313 = vmatprep.subr.bf16.mxu0 %v1949_v58  ;;  %1436 = vmatprep.subr.bf16.mxu1 %v1952_v59  ;;  %v2044_v58 = vld [vmem:[#allocation5 + $0x58c] ss:$16 sps:$4 sm:$0xff]   ;;  %v2039_v59 = vld [vmem:[#allocation5 + $0x580] ss:$16 sps:$4 sm:$0xff]  }
  0x9e   :  { %1314 = vmatpush1.bf16.msra.mxu0 %v1947_v60  ;;  %1437 = vmatpush1.bf16.msra.mxu1 %v1950_v61  ;;  %v2042_v60 = vld [vmem:[#allocation5 + $0x588] ss:$16 sps:$4 sm:$0xff]   ;;  %v2047_v61 = vld [vmem:[#allocation5 + $0x5a4] ss:$16 sps:$4 sm:$0xff]  }
  0x9f   :  { %1315 = vmatprep.subr.bf16.mxu0 %v1955_v62  ;;  %1438 = vmatprep.subr.bf16.mxu1 %v1958_v63  ;;  %v2050_v62 = vld [vmem:[#allocation5 + $0x5ac] ss:$16 sps:$4 sm:$0xff]   ;;  %v2045_v63 = vld [vmem:[#allocation5 + $0x5a0] ss:$16 sps:$4 sm:$0xff]  }
  0xa2   :  { %1316 = vmatpush1.bf16.msra.mxu0 %v1953_v0  ;;  %1439 = vmatpush1.bf16.msra.mxu1 %v1956_v1  ;;  %v2048_v0 = vld [vmem:[#allocation5 + $0x5a8] ss:$16 sps:$4 sm:$0xff]   ;;  %v2053_v1 = vld [vmem:[#allocation5 + $0x5c4] ss:$16 sps:$4 sm:$0xff]  }
  0xa3   :  { %1317 = vmatprep.subr.bf16.mxu0 %v1961_v2  ;;  %1440 = vmatprep.subr.bf16.mxu1 %v1964_v3  ;;  %v2056_v2 = vld [vmem:[#allocation5 + $0x5cc] ss:$16 sps:$4 sm:$0xff]   ;;  %v2051_v3 = vld [vmem:[#allocation5 + $0x5c0] ss:$16 sps:$4 sm:$0xff]  }
  0xa6   :  { %1318 = vmatpush1.bf16.msra.mxu0 %v1959_v4  ;;  %1441 = vmatpush1.bf16.msra.mxu1 %v1962_v5  ;;  %v2054_v4 = vld [vmem:[#allocation5 + $0x5c8] ss:$16 sps:$4 sm:$0xff]   ;;  %v2059_v5 = vld [vmem:[#allocation5 + $0x5e4] ss:$16 sps:$4 sm:$0xff]  }
  0xa7   :  { %1328 = vmatprep.subr.bf16.mxu0 %v1969_v6  ;;  %1451 = vmatprep.subr.bf16.mxu1 %v1972_v7  ;;  %v2062_v6 = vld [vmem:[#allocation5 + $0x5ec] ss:$16 sps:$4 sm:$0xff]   ;;  %v2057_v7 = vld [vmem:[#allocation5 + $0x5e0] ss:$16 sps:$4 sm:$0xff]  }
  0xa9   :  { %1320 = vmatmul.mubr.bf16.vlgmr.msra.gmra.mrb[0].mxu0 %v1550_v8  ;;  %1443 = vmatmul.mubr.bf16.vlgmr.msra.gmra.mrb[0].mxu1 %v1550_v8  ;;  %v2060_v8 = vld [vmem:[#allocation5 + $0x5e8] ss:$16 sps:$4 sm:$0xff]  }
  0xaa   :  { %1329 = vmatpush1.bf16.msra.mxu0 %v1967_v9  ;;  %1452 = vmatpush1.bf16.msra.mxu1 %v1970_v10  ;;  %v1552_v9 = vcombine.low %v2191_v11, %v2191_v11  ;;  %v245_v10 = vlaneseq  ;;  %v1496_v11 = vld [vmem:[%s2209_s3] sm:$0xf] }
  0xab   :  { %1330 = vmatprep.subr.bf16.mxu0 %v1975_v12  ;;  %1453 = vmatprep.subr.bf16.mxu1 %v1978_v13 }
  0xac   :  { %1360 = vmatprep.mubr.bf16.mxu0 %v1553_v14  ;;  %1483 = vmatprep.mubr.bf16.mxu1 %v1553_v14  ;;  %v246_v12 = vshrl.u32 %v245_v10, 7 }
  0xae   :  { %1331 = vmatpush1.bf16.msra.mxu0 %v1973_v15  ;;  %1454 = vmatpush1.bf16.msra.mxu1 %v1976_v16  ;;  %v247_v13 = vsub.s32 0, %v246_v12  ;;  %v255_v14 = vsub.s32 2, %v246_v12  ;;  %v243_v15 = vld [vmem:[%s2208_s2] sm:$0xf]  ;;  %v251_v16 = vsub.s32 1, %v246_v12 }
  0xaf   :  { %1332 = vmatprep.subr.bf16.mxu0 %v1981_v17  ;;  %1455 = vmatprep.subr.bf16.mxu1 %v1984_v18  ;;  %v259_v17 = vsub.s32 3, %v246_v12 }
  0xb0   :  { %v248_v18 = vrot.slane %v243_v15, %v247_v13 }
  0xb2   :  { %1333 = vmatpush1.bf16.msra.mxu0 %v1979_v19  ;;  %1456 = vmatpush1.bf16.msra.mxu1 %v1982_v20  ;;  %v256_v19 = vrot.slane %v243_v15, %v255_v14  ;;  %v252_v20 = vrot.slane %v243_v15, %v251_v16 }
  0xb3   :  { %1334 = vmatprep.subr.bf16.mxu0 %v1987_v21  ;;  %1457 = vmatprep.subr.bf16.mxu1 %v1990_v22  ;;  %v260_v21 = vrot.slane %v243_v15, %v259_v17 }
  0xb6   :  { %1335 = vmatpush1.bf16.msra.mxu0 %v1985_v23  ;;  %1458 = vmatpush1.bf16.msra.mxu1 %v1988_v24 }
  0xb7   :  { %1336 = vmatprep.subr.bf16.mxu0 %v1993_v25  ;;  %1459 = vmatprep.subr.bf16.mxu1 %v1996_v26  ;;  %v1501_v25 = vrot.slane %v1496_v11, %v247_v13 }
  0xba   :  { %1337 = vmatpush1.bf16.msra.mxu0 %v1991_v27  ;;  %1460 = vmatpush1.bf16.msra.mxu1 %v1994_v28 }
  0xbb   :  { %1338 = vmatprep.subr.bf16.mxu0 %v1999_v29  ;;  %1461 = vmatprep.subr.bf16.mxu1 %v2002_v30  ;;  %v1505_v30 = vrot.slane %v1496_v11, %v251_v16 }
  0xbe   :  { %1339 = vmatpush1.bf16.msra.mxu0 %v1997_v31  ;;  %1462 = vmatpush1.bf16.msra.mxu1 %v2000_v32 }
  0xbf   :  { %1340 = vmatprep.subr.bf16.mxu0 %v2005_v33  ;;  %1463 = vmatprep.subr.bf16.mxu1 %v2008_v34 }
  0xc2   :  { %1341 = vmatpush1.bf16.msra.mxu0 %v2003_v35  ;;  %1464 = vmatpush1.bf16.msra.mxu1 %v2006_v36 }
  0xc3   :  { %1342 = vmatprep.subr.bf16.mxu0 %v2011_v37  ;;  %1465 = vmatprep.subr.bf16.mxu1 %v2014_v38  ;;  %v1509_v38 = vrot.slane %v1496_v11, %v255_v14 }
  0xc6   :  { %1343 = vmatpush1.bf16.msra.mxu0 %v2009_v39  ;;  %1466 = vmatpush1.bf16.msra.mxu1 %v2012_v40 }
  0xc7   :  { %1344 = vmatprep.subr.bf16.mxu0 %v2017_v41  ;;  %1467 = vmatprep.subr.bf16.mxu1 %v2020_v42 }
  0xca   :  { %1345 = vmatpush1.bf16.msra.mxu0 %v2015_v43  ;;  %1468 = vmatpush1.bf16.msra.mxu1 %v2018_v44  ;;  %v1513_v43 = vrot.slane %v1496_v11, %v259_v17 }
  0xcb   :  { %1346 = vmatprep.subr.bf16.mxu0 %v2023_v45  ;;  %1469 = vmatprep.subr.bf16.mxu1 %v2026_v46 }
  0xce   :  { %1347 = vmatpush1.bf16.msra.mxu0 %v2021_v47  ;;  %1470 = vmatpush1.bf16.msra.mxu1 %v2024_v48 }
  0xcf   :  { %1348 = vmatprep.subr.bf16.mxu0 %v2029_v49  ;;  %1471 = vmatprep.subr.bf16.mxu1 %v2032_v50  ;;  %v1746_v49 = vld [vmem:[#allocation2] ss:$0 sm:$0xff] }
  0xd2   :  { %1349 = vmatpush1.bf16.msra.mxu0 %v2027_v51  ;;  %1472 = vmatpush1.bf16.msra.mxu1 %v2030_v52 }
  0xd3   :  { %1350 = vmatprep.subr.bf16.mxu0 %v2035_v53  ;;  %1473 = vmatprep.subr.bf16.mxu1 %v2038_v54 }
  0xd6   :  { %1351 = vmatpush1.bf16.msra.mxu0 %v2033_v55  ;;  %1474 = vmatpush1.bf16.msra.mxu1 %v2036_v56 }
  0xd7   :  { %1352 = vmatprep.subr.bf16.mxu0 %v2041_v57  ;;  %1475 = vmatprep.subr.bf16.mxu1 %v2044_v58 }
  0xda   :  { %1353 = vmatpush1.bf16.msra.mxu0 %v2039_v59  ;;  %1476 = vmatpush1.bf16.msra.mxu1 %v2042_v60 }
  0xdb   :  { %1354 = vmatprep.subr.bf16.mxu0 %v2047_v61  ;;  %1477 = vmatprep.subr.bf16.mxu1 %v2050_v62 }
  0xde   :  { %1355 = vmatpush1.bf16.msra.mxu0 %v2045_v63  ;;  %1478 = vmatpush1.bf16.msra.mxu1 %v2048_v0 }
  0xdf   :  { %1356 = vmatprep.subr.bf16.mxu0 %v2053_v1  ;;  %1479 = vmatprep.subr.bf16.mxu1 %v2056_v2 }
  0xe2   :  { %1357 = vmatpush1.bf16.msra.mxu0 %v2051_v3  ;;  %1480 = vmatpush1.bf16.msra.mxu1 %v2054_v4 }
  0xe3   :  { %1358 = vmatprep.subr.bf16.mxu0 %v2059_v5  ;;  %1481 = vmatprep.subr.bf16.mxu1 %v2062_v6 }
  0xe6   :  { %1359 = vmatpush1.bf16.msra.mxu0 %v2057_v7  ;;  %1482 = vmatpush1.bf16.msra.mxu1 %v2060_v8 }
  0xe9   :  { %1361 = vmatmul.mubr.bf16.vlgmr.msra.gmra.mrb[0].mxu0 %v1552_v9  ;;  %1484 = vmatmul.mubr.bf16.vlgmr.msra.gmra.mrb[0].mxu1 %v1552_v9 }
 0x1bc   :  { %v1362_v22 = vpop.f32.mrb[0].mxu0  ;;  %v1485_v23 = vpop.f32.mrb[0].mxu1 }
 0x1bd   :  { %v1747_v24 = vadd.f32 %v1362_v22, %v248_v18  ;;  %v1749_v26 = vadd.f32 %v1485_v23, %v256_v19  ;;  %v1364_v27 = vpop.f32.mrb[1].mxu0  ;;  %v1487_v28 = vpop.f32.mrb[1].mxu1 }
 0x1be   :  { %v1748_v29 = vadd.f32 %v1364_v27, %v252_v20  ;;  %v1750_v31 = vadd.f32 %v1487_v28, %v260_v21  ;;  %v1366_v32 = vpop.f32.mrb[2].mxu0  ;;  %v1489_v33 = vpop.f32.mrb[2].mxu1 }
 0x1bf   :  { %v1492_v34 = vmax.f32 %v1747_v24, 0.0  ;;  %v1367_v35 = vpop.f32.mrb[3].mxu0  ;;  %v1490_v36 = vpop.f32.mrb[3].mxu1  ;;  %v1494_v37 = vmax.f32 %v1749_v26, 0.0 }
 0x1c0   :  { %v1493_v39 = vmax.f32 %v1748_v29, 0.0  ;;  %v1495_v42 = vmax.f32 %v1750_v31, 0.0 }
 0x1c1   :  { %v1518_v40 = vmul.f32 %v1501_v25, %v1492_v34  ;;  %v1520_v44 = vmul.f32 %v1509_v38, %v1494_v37 }
 0x1c2   :  { %v1519_v41 = vmul.f32 %v1505_v30, %v1493_v39  ;;  %v1521_v46 = vmul.f32 %v1513_v43, %v1495_v42 }
 0x1c4   :  { %v1522_v45 = vadd.f32 %v1519_v41, %v1518_v40 }
 0x1c6   :  { %v1523_v47 = vadd.f32 %v1522_v45, %v1520_v44 }
 0x1c8   :  { %v1524_v48 = vadd.f32 %v1523_v47, %v1521_v46 }
 0x1ca   :  { %1525 = vadd.xlane.f32.xlu0 %v1524_v48 }
 0x257   :  { %v1526_v50 = vpop.xlane.xlu0 %1525 }
 0x258   :  { %v1534_v51 = vadd.f32 %v1746_v49, %v1526_v50 }
 0x25a   :  { %v1535_v52 = vsub.f32 0.0, %v1534_v51 }
 0x25c   :  { %v1536_v53 = vmul.f32 1.442695, %v1535_v52 }
 0x25e   :  { %2065 = vpow2.f32 %v1536_v53 }
 0x268   :  { %v2066_v54 = vpop.eup %2065 }
 0x269   :  { %v1538_v55 = vadd.f32 1.0, %v2066_v54 }
 0x26b   :  { %2067 = vrcp.f32 %v1538_v55 }
 0x275   :  { %v2068_v56 = vpop.eup %2067 }
 0x276   :  { %1541 = vst.msk [vmem:[%s2211_s5] sm:$0xff] %vm1540_vm0, %v2068_v56 }
 0x277   :  { %1546 = vsyncpa [#allocation4], 1 }
 0x278   :  { %1547 = vsyncpa [#allocation6], 1 }

</bundles_post_ra>
